<compile_context>
chip_gen: v7x
topology: tpu7x:2x2x1
jax: 0.10.0
libtpu: 0.0.40
codegen_flags: <defaults>
</compile_context>

<pallas_src>
import functools

import jax
import jax.numpy as jnp
from jax.experimental import pallas as pl
from jax.experimental.pallas import tpu as pltpu


def _bilinear_matrix(in_size: int, out_size: int) -> jnp.ndarray:
    """(out_size, in_size) matrix s.t. W @ v == 1D bilinear resize of v.

    Matches torch.nn.functional.interpolate(..., mode='bilinear',
    align_corners=False): src = (i + 0.5) * (in/out) - 0.5, clamped to
    [0, in-1], upper gather index clamped at in-1.
    """
    scale = in_size / out_size
    i = jnp.arange(out_size, dtype=jnp.float32)
    src = (i + 0.5) * scale - 0.5
    src = jnp.clip(src, 0.0, float(in_size - 1))
    lo = jnp.floor(src).astype(jnp.int32)
    hi = jnp.minimum(lo + 1, in_size - 1)
    frac = src - lo.astype(jnp.float32)
    rows = jnp.arange(out_size)
    W = jnp.zeros((out_size, in_size), jnp.float32)
    W = W.at[rows, lo].add(1.0 - frac)
    W = W.at[rows, hi].add(frac)
    return W


def _nearest_matrix(in_size: int, out_size: int) -> jnp.ndarray:
    """(out_size, in_size) one-hot matrix matching F.interpolate mode='nearest'."""
    scale = in_size / out_size
    i = jnp.arange(out_size, dtype=jnp.float32)
    src = jnp.minimum(jnp.floor(i * scale).astype(jnp.int32), in_size - 1)
    W = jnp.zeros((out_size, in_size), jnp.float32)
    W = W.at[jnp.arange(out_size), src].set(1.0)
    return W


# Per-image batched matmuls (shared Wy) under-utilize the 256x256 MXU, so they
# are weighted more heavily than the single large well-utilized 2D matmul.
_BATCHED_MXU_PENALTY = 2.0


def _choose_h_first(H: int, W: int, OH: int, OW: int) -> bool:
    cost_h_first = OH * W * OW + _BATCHED_MXU_PENALTY * OH * H * W
    cost_w_first = H * W * OW + _BATCHED_MXU_PENALTY * OH * H * OW
    return cost_h_first <= cost_w_first


def _choose_images_per_block(nc: int, per_image_bytes: int, fixed_bytes: int,
                             vmem_budget_bytes: int = 10 * 1024 * 1024,
                             min_grid_steps: int = 2) -> int:
    """Largest divisor of nc whose block footprint fits the VMEM budget;
    prefer >=2 grid steps so the pipeline double-buffers and the NC axis can
    shard across v7x's 2 TensorCores."""
    budget = max(vmem_budget_bytes - fixed_bytes, per_image_bytes)
    divisors = [d for d in range(1, nc + 1) if nc % d == 0]
    fits = [d for d in divisors if d * per_image_bytes <= budget] or [1]
    preferred = [d for d in fits if nc // d >= min_grid_steps]
    return max(preferred) if preferred else max(fits)


def _interp_kernel(wy_ref, wxT_ref, x_ref, o_ref, *, h_first: bool):
    # wy_ref : (OH, H)      compute dtype (f32 or bf16), resident in VMEM
    # wxT_ref: (W, OW)      compute dtype, resident in VMEM
    # x_ref  : (TC, H, W)   compute dtype
    # o_ref  : (TC, OH, OW) output dtype
    x = x_ref[...]                       # (TC, H, W)
    TC, H, W = x.shape
    OH = wy_ref.shape[0]
    OW = wxT_ref.shape[1]

    # Shared row-interpolation weights, broadcast once per block (cheap; the
    # batched dot_general needs matching batch dims on both operands).
    wy_b = jnp.broadcast_to(wy_ref[...], (TC, OH, H))

    if h_first:
        # 1) H-contraction, batched over the TC images: (TC,OH,H)@(TC,H,W)
        t = jnp.einsum('boh,bhw->bow', wy_b, x,
                       preferred_element_type=jnp.float32)        # (TC, OH, W) f32
        t = t.astype(x.dtype)
        # 2) W-contraction as one large, well-utilized 2D MXU matmul.
        out2d = jnp.dot(t.reshape(TC * OH, W), wxT_ref[...],
                        preferred_element_type=jnp.float32)        # (TC*OH, OW)
        out = out2d.reshape(TC, OH, OW)
    else:
        # 1) W-contraction as one large 2D MXU matmul.
        t2d = jnp.dot(x.reshape(TC * H, W), wxT_ref[...],
                      preferred_element_type=jnp.float32)          # (TC*H, OW)
        t = t2d.reshape(TC, H, OW).astype(x.dtype)
        # 2) H-contraction, batched over the TC images.
        out = jnp.einsum('boh,bhw->bow', wy_b, t,
                         preferred_element_type=jnp.float32)       # (TC, OH, OW)

    o_ref[...] = out.astype(o_ref.dtype)


def interpolate_2d(x: jnp.ndarray, size, mode: str = "bilinear") -> jnp.ndarray:
    """Resize NCHW input `x` to spatial `size` (out_h, out_w)."""
    if isinstance(size, int):
        size = (size, size)
    N, C, H, W = x.shape
    OH, OW = int(size[0]), int(size[1])
    NC = N * C

    # Keep bf16 on the MXU (2-4x throughput), otherwise compute in f32.
    # Accumulation is always f32 (preferred_element_type in the kernel).
    compute_dtype = jnp.bfloat16 if x.dtype == jnp.bfloat16 else jnp.float32

    if mode == "bilinear":
        wy = _bilinear_matrix(H, OH)
        wx = _bilinear_matrix(W, OW)
    elif mode == "nearest":
        wy = _nearest_matrix(H, OH)
        wx = _nearest_matrix(W, OW)
    else:
        # TODO(synk): bicubic / antialiased modes are not implemented.
        raise NotImplementedError(f"mode={mode!r} is not implemented")

    wy = wy.astype(compute_dtype)          # (OH, H)
    wxT = wx.T.astype(compute_dtype)       # (W, OW)

    x_flat = x.reshape(NC, H, W).astype(compute_dtype)

    # Pick the cheaper contraction order (MXU cost with batched-op penalty).
    h_first = _choose_h_first(H, W, OH, OW)

    # Images per grid step, sized against a conservative VMEM budget.
    in_b = jnp.dtype(compute_dtype).itemsize
    out_b = jnp.dtype(x.dtype).itemsize
    inter_elems = OH * W if h_first else H * OW
    per_image_bytes = (
        2 * H * W * in_b            # input block (double-buffered by Pallas)
        + 2 * OH * OW * out_b       # output block (double-buffered)
        + OH * H * in_b             # broadcast copy of Wy for the batched dot
        + inter_elems * (4 + in_b)  # f32 intermediate + compute-dtype cast
        + OH * OW * 4               # f32 accumulator before final cast
    )
    fixed_bytes = 2 * (OH * H + W * OW) * in_b   # resident weights (x2 for safety)
    TC = _choose_images_per_block(NC, per_image_bytes, fixed_bytes)
    grid = (NC // TC,)

    kernel = functools.partial(_interp_kernel, h_first=h_first)

    out_flat = pl.pallas_call(
        kernel,
        out_shape=jax.ShapeDtypeStruct((NC, OH, OW), x.dtype),
        grid_spec=pltpu.PrefetchScalarGridSpec(
            num_scalar_prefetch=0,
            grid=grid,
            in_specs=[
                pl.BlockSpec((OH, H), lambda i: (0, 0)),        # Wy   (resident)
                pl.BlockSpec((W, OW), lambda i: (0, 0)),        # Wx^T (resident)
                pl.BlockSpec((TC, H, W), lambda i: (i, 0, 0)),  # TC images / step
            ],
            out_specs=pl.BlockSpec((TC, OH, OW), lambda i: (i, 0, 0)),
        ),
        compiler_params=pltpu.CompilerParams(
            dimension_semantics=("parallel",),   # shards NC across TCs on v7x
            vmem_limit_bytes=48 * 1024 * 1024,
        ),
    )(wy, wxT, x_flat)

    return out_flat.reshape(N, C, OH, OW)


class Interpolate:
    """JAX/Pallas port of the PyTorch Interpolate module."""

    def __init__(self, size, mode="bilinear"):
        assert mode in ("bilinear", "nearest"), \
            "only mode='bilinear' and mode='nearest' are implemented"
        self.size = size
        self.mode = mode

    def __call__(self, x):
        return interpolate_2d(x, self.size, self.mode)


if __name__ == "__main__":
    key = jax.random.PRNGKey(0)
    # NCHW input, small shapes
    x = jax.random.normal(key, (2, 4, 16, 16), dtype=jnp.float32)

    # Case 1: bilinear, mixed down/up-sampling (H-first contraction order).
    size1 = (8, 12)
    out1 = jax.block_until_ready(Interpolate(size1, mode="bilinear")(x))
    wy1 = _bilinear_matrix(16, size1[0])
    wx1 = _bilinear_matrix(16, size1[1])
    ref1 = jnp.einsum("oh,nchw,pw->ncop", wy1, x, wx1)
    assert out1.shape == (2, 4, 8, 12)
    assert jnp.allclose(out1, ref1, atol=1e-4, rtol=1e-4)

    # Case 2: bilinear, width down-sampling (W-first contraction order).
    size2 = (16, 8)
    out2 = jax.block_until_ready(Interpolate(size2, mode="bilinear")(x))
    wy2 = _bilinear_matrix(16, size2[0])
    wx2 = _bilinear_matrix(16, size2[1])
    ref2 = jnp.einsum("oh,nchw,pw->ncop", wy2, x, wx2)
    assert out2.shape == (2, 4, 16, 8)
    assert jnp.allclose(out2, ref2, atol=1e-4, rtol=1e-4)

    # Case 3: nearest mode.
    out3 = jax.block_until_ready(Interpolate((8, 12), mode="nearest")(x))
    wy3 = _nearest_matrix(16, 8)
    wx3 = _nearest_matrix(16, 12)
    ref3 = jnp.einsum("oh,nchw,pw->ncop", wy3, x, wx3)
    assert out3.shape == (2, 4, 8, 12)
    assert jnp.allclose(out3, ref3, atol=1e-4, rtol=1e-4)

    print("KERNEL_OK")
</pallas_src>

<mosaic_0001>
module attributes {stable_mosaic.version = 11 : i64} {
  func.func @_interp_kernel(%arg0: i32, %arg1: memref<8x16xf32, #tpu.memory_space<vmem>>, %arg2: memref<16x12xf32, #tpu.memory_space<vmem>>, %arg3: memref<4x16x16xf32, #tpu.memory_space<vmem>>, %arg4: memref<4x8x12xf32, #tpu.memory_space<vmem>>) attributes {dimension_semantics = [#tpu.dimension_semantics<parallel>], iteration_bounds = array<i64: 2>, scalar_prefetch = 0 : i64, scratch_operands = 0 : i64, tpu.core_type = #tpu.core_type<tc>, window_params = [{pipeline_mode = #tpu.pipeline_mode<synchronous>, transform_indices = @transform_0, window_bounds = array<i64: 8, 16>}, {pipeline_mode = #tpu.pipeline_mode<synchronous>, transform_indices = @transform_1, window_bounds = array<i64: 16, 12>}, {transform_indices = @transform_2, window_bounds = array<i64: 4, 16, 16>}, {transform_indices = @transform_3, window_bounds = array<i64: 4, 8, 12>}]} {
    %c0 = arith.constant 0 : index
    %c0_0 = arith.constant 0 : index
    %c0_1 = arith.constant 0 : index
    %0 = vector.load %arg3[%c0, %c0_0, %c0_1] : memref<4x16x16xf32, #tpu.memory_space<vmem>>, vector<4x16x16xf32>
    %c0_2 = arith.constant 0 : index
    %c0_3 = arith.constant 0 : index
    %1 = vector.load %arg1[%c0_2, %c0_3] : memref<8x16xf32, #tpu.memory_space<vmem>>, vector<8x16xf32>
    %2 = vector.shape_cast %1 : vector<8x16xf32> to vector<1x8x16xf32>
    %3 = vector.broadcast %2 : vector<1x8x16xf32> to vector<4x8x16xf32>
    "tpu.trace_start"() <{level = 10 : i32, message = "boh,bhw->bow"}> : () -> ()
    %cst = arith.constant dense<0.000000e+00> : vector<4x8x16xf32>
    %4 = tpu.matmul %3, %0, %cst {dimension_numbers = #tpu.dot_dimension_numbers<[2], [1], [1], [2], [0, 0, 0, 1, 1, 2], [0], [0]>} : vector<4x8x16xf32>, vector<4x16x16xf32>, vector<4x8x16xf32> -> vector<4x8x16xf32>
    "tpu.trace_stop"() : () -> ()
    %5 = vector.shape_cast %4 : vector<4x8x16xf32> to vector<32x16xf32>
    %c0_4 = arith.constant 0 : index
    %c0_5 = arith.constant 0 : index
    %6 = vector.load %arg2[%c0_4, %c0_5] : memref<16x12xf32, #tpu.memory_space<vmem>>, vector<16x12xf32>
    %cst_6 = arith.constant dense<0.000000e+00> : vector<32x12xf32>
    %7 = tpu.matmul %5, %6, %cst_6 {dimension_numbers = #tpu.dot_dimension_numbers<[1], [0], [0], [1], [0, 0, 1, 1], [], []>} : vector<32x16xf32>, vector<16x12xf32>, vector<32x12xf32> -> vector<32x12xf32>
    %8 = vector.shape_cast %7 : vector<32x12xf32> to vector<4x8x12xf32>
    %c0_7 = arith.constant 0 : index
    %c0_8 = arith.constant 0 : index
    %c0_9 = arith.constant 0 : index
    %9 = vector.load %arg4[%c0_7, %c0_8, %c0_9] : memref<4x8x12xf32, #tpu.memory_space<vmem>>, vector<4x8x12xf32>
    tpu.vector_store %arg4[%c0_7, %c0_8, %c0_9], %8 {strides = array<i32>} : memref<4x8x12xf32, #tpu.memory_space<vmem>>, vector<4x8x12xf32>,
    return
  }
  func.func @transform_0(%arg0: i32) -> (i32, i32) {
    %c0_i32 = arith.constant 0 : i32
    %c0_i32_0 = arith.constant 0 : i32
    %c0_i32_1 = arith.constant 0 : i32
    return %c0_i32, %c0_i32_0 : i32, i32
  }
  func.func @transform_1(%arg0: i32) -> (i32, i32) {
    %c0_i32 = arith.constant 0 : i32
    %c0_i32_0 = arith.constant 0 : i32
    %c0_i32_1 = arith.constant 0 : i32
    return %c0_i32, %c0_i32_0 : i32, i32
  }
  func.func @transform_2(%arg0: i32) -> (i32, i32, i32) {
    %c0_i32 = arith.constant 0 : i32
    %c0_i32_0 = arith.constant 0 : i32
    %c0_i32_1 = arith.constant 0 : i32
    return %arg0, %c0_i32, %c0_i32_0 : i32, i32, i32
  }
  func.func @transform_3(%arg0: i32) -> (i32, i32, i32) {
    %c0_i32 = arith.constant 0 : i32
    %c0_i32_0 = arith.constant 0 : i32
    %c0_i32_1 = arith.constant 0 : i32
    return %arg0, %c0_i32, %c0_i32_0 : i32, i32, i32
  }
}

</mosaic_0001>

<bundles_post_ra>
// kernel: tpu_custom_call.1
= control target key start
LH: loop header
LB: loop body
LE: loop exit
PB: predicated region body
PF: predicated region fallthrough
CT: control target
= control target key end

     0   :  { %8 = vsyncpa [#allocation3], 0  ;;  %s1344_s0 = inlined_call_operand.hbm [shape: f32[8,16], index: 0, kind: input, shape index: {}]   ;;  %s1345_s1 = inlined_call_operand.hbm [shape: f32[16,12], index: 1, kind: input, shape index: {}]   ;;  %s1346_s2 = inlined_call_operand.hbm [shape: f32[8,16,16], index: 2, kind: input, shape index: {}]   ;;  %s1347_s3 = inlined_call_operand.hbm [shape: f32[8,8,12], index: 3, kind: output, shape index: {}]  }
   0x1   :  { %9 = vsyncpa [#allocation6], 0 }
   0x2   :  { %10 = vsyncpa [#allocation4], 0 }
   0x3   :  { %12 = vsyncpa [#allocation4 + $0x1], 0  ;;  %s1089_s12 = smov 0   ;;  %s1091_s13 = smov 0  }
   0x4   :  { %s1093_s14 = smov 0   ;;  %s1095_s15 = smov 0  }
   0x5 LB: > { %s1110_s16 = sadd.s32 4294967295, %s1056_s15   ;;  %s720_s17 = sadd.s32 4294967294, %s1056_s15   ;;  %s1056_s15 = sphi %s1095_s15, %s1374_s15   ;;  %s1052_s14 = sphi %s1093_s14, %s1373_s14   ;;  %s1048_s13 = sphi %s1091_s13, %s1372_s13   ;;  %s1044_s12 = sphi %s1089_s12, %s1371_s12  }
   0x6   : > { %s1114_s18 = sadd.s32 1, %s1056_s15   ;;  %s67_s19 = sadd.s32 1, %s1052_s14 }
   0x7   : > { %s64_s20 = ssub.s32 %s1056_s15, %s1114_s18  ;;  %p74_p0 = scmp.ne.s32.totalorder %s1052_s14, %s1048_s13 }
   0x8   : > { %p65_p1 = scmp.eq.s32.totalorder %s64_s20, 0  ;;  %p75_p2 = scmp.eq.s32.totalorder %s1056_s15, 0 }
   0x9   : > { %p80_p3 = scmp.ne.s32.totalorder %s1048_s13, %s1044_s12  ;;  %p1348_p4 = scmp.eq.s32.totalorder %s1110_s16, 0 }
   0xa   : > { %s1126_s21 = scalar_select %p65_p1, %s1052_s14, %s67_s19  }
   0xb   : > { %p1128_p5 = por %p75_p2, %p74_p0  ;;  %p1134_p6 = por %p1348_p4, %p80_p3 }
   0xc   : > { %p104_p7 = scmp.eq.s32.totalorder %s1110_s16, 1  ;;  %p110_p8 = scmp.eq.s32.totalorder %s720_s17, 1 }
   0xd   : > { %s1354_s23 = scalar_select %p1134_p6, 1, 0 }
   0xe   : > { %p721_p9 = scmp.ge.s32.totalorder %s1056_s15, 1  ;;  %p117_p10 = scmp.lt.s32.totalorder %s1056_s15, 3 }
   0xf   : > { %p1141_p11 = por %p104_p7, %p74_p0  ;;  %p1145_p12 = por %p110_p8, %p80_p3 }
  0x10   : > { %p1149_p13 = pnand %p721_p9, %p117_p10  ;;  %s1058_s27 = smov [#allocation2]  }
  0x11   : > { %s1355_s24 = scalar_select %p1141_p11, 1, 0 }
  0x12   : > { %s1356_s25 = scalar_select %p1145_p12, 1, 0 }
  0x13   : > { %s1357_s26 = scalar_select %p1149_p13, 1, 0 }
  0x14   : > { %p834_p2 = pneg %p1149_p13  ;;  %s130_s28 = sshll.u32 %s1058_s27, 4  ;;  %s131_s28 = int_to_ptr.vmem [resolvable:$true] %s130_s28 }
  0x15   : > { %p851_p4 = scmp.lt.s32.totalorder %s1056_s15, 2  ;;  %p1358_p0 = scmp.eq.s32.totalorder %s1110_s16, 0 }
  0x16   : > { %s1059_s4 = smov [#allocation5]   ;;  %s896_s8 = scalar_lea.hbm %s1344_s0, 128 }
  0x17   : > { %p1159_p7 = pnand %p834_p2, %p1358_p0  ;;  %p1165_p3 = pnand %p851_p4, %p1128_p5 }
  0x18   : > { %s140_s5 = sshll.u32 %s1059_s4, 4  ;;  %p897_p8 = scmp.ne.s32.totalorder %s1344_s0, %s896_s8  ;;  %s1169_s5 = int_to_ptr.vmem [resolvable:$true] %s140_s5 }
  0x19   : > { %s1360_s30 = scalar_select %p1165_p3, 1, 0 }
  0x1a   : > { %p898_p9 = pneg %p1159_p7  ;;  %p903_p10 = scmp.lt.u32.totalorder %s896_s8, %s1344_s0 }
  0x1c   : > { %p899_p4 = pnand %p898_p9, %p897_p8 }
  0x1e   : > { %p900_p5 = pneg %p899_p4 }
  0x20   : > { %p905_p2 = pnand %p903_p10, %p900_p5 }
  0x22   : > { %908 = shalt.err (!%p905_p2)
}
  0x23   : > { %s909_s19 = scalar_lea.vmem %s131_s28, 128  ;;  %p917_p11 = scmp.lt.s32.totalorder %s131_s28, %s131_s28 }
  0x24   : > { %p910_p0 = scmp.ne.s32.totalorder %s131_s28, %s909_s19  ;;  %p918_p6 = scmp.lt.s32.totalorder %s909_s19, %s909_s19 }
  0x26   : > { %p912_p1 = pnand %p910_p0, %p898_p9  ;;  %p919_p13 = por %p918_p6, %p917_p11 }
  0x28   : > { %p913_p12 = pneg %p912_p1 }
  0x2a   : > { %p920_p3 = pnand %p919_p13, %p913_p12 }
  0x2c   : > { %923 = shalt.err (!%p920_p3)
}
  0x2d   : > { %837 = dma.hbm_to_vmem [thread:$0]  (!%p1159_p7), %s1344_s0, 128, %s131_s28, [#allocation3]  }
  0x2e   : > { %s154_s27 = sand.u32 1, %s1056_s15   ;;  %s924_s7 = scalar_lea.hbm %s1345_s1, 256 }
  0x2f   : > { %p925_p1 = scmp.ne.s32.totalorder %s1345_s1, %s924_s7  ;;  %p931_p12 = scmp.lt.u32.totalorder %s924_s7, %s1345_s1 }
  0x31   : > { %p927_p6 = pnand %p925_p1, %p898_p9 }
  0x33   : > { %p928_p11 = pneg %p927_p6 }
  0x35   : > { %p933_p13 = pnand %p931_p12, %p928_p11 }
  0x37   : > { %936 = shalt.err (!%p933_p13)
}
  0x38   : > { %s937_s28 = scalar_lea.vmem %s1169_s5, 256  ;;  %p945_p5 = scmp.lt.s32.totalorder %s1169_s5, %s1169_s5 }
  0x39   : > { %p938_p3 = scmp.ne.s32.totalorder %s1169_s5, %s937_s28  ;;  %p946_p10 = scmp.lt.s32.totalorder %s937_s28, %s937_s28 }
  0x3b   : > { %p940_p8 = pnand %p938_p3, %p898_p9  ;;  %p947_p2 = por %p946_p10, %p945_p5 }
  0x3d   : > { %p941_p4 = pneg %p940_p8 }
  0x3f   : > { %p948_p0 = pnand %p947_p2, %p941_p4 }
  0x41   : > { %951 = shalt.err (!%p948_p0)
}
  0x42   : > { %s1060_s17 = smov 128   ;;  %s1061_s19 = smov 8  }
  0x43   : > { %840 = dma.hbm_to_vmem [thread:$0]  (!%p1159_p7), %s1345_s1, 256, %s1169_s5, [#allocation6], %s1060_s17, %s1060_s17, %s1061_s19  }
  0x44   : > { %s156_s4 = sand.u32 1, %s1052_s14   ;;  %s748_s7 = sshll.u32 %s1056_s15, 10 }
  0x45   : > { %s725_s6 = sshll.u32 %s156_s4, 6  ;;  %s1227_s10 = scalar_lea.hbm %s1346_s2, %s748_s7 }
  0x46   : > { %s158_s29 = scalar_lea.vmem [#allocation7], %s725_s6  ;;  %s1231_s28 = scalar_lea.sflag [#allocation3], %s154_s27 }
  0x47   : > { %s166_s11 = sshll.u32 %s158_s29, 4  ;;  %s952_s20 = scalar_lea.hbm %s1227_s10, 1024  ;;  %s1229_s11 = int_to_ptr.vmem [resolvable:$true] %s166_s11 }
  0x48   : > { %p953_p7 = scmp.ne.s32.totalorder %s1227_s10, %s952_s20  ;;  %p1361_p9 = scmp.ne.s32.totalorder %s1360_s30, 0 }
  0x49   : > { %s957_s4 = scalar_lea.hbm %s1346_s2, 2048  ;;  %p958_p12 = scmp.lt.u32.totalorder %s1227_s10, %s1346_s2 }
  0x4a   : > { %p954_p1 = pneg %p1361_p9  ;;  %p959_p13 = scmp.lt.u32.totalorder %s957_s4, %s952_s20 }
  0x4b   : > { %p961_p8 = scmp.lt.u32.totalorder %s952_s20, %s1227_s10 }
  0x4c   : > { %p955_p6 = pnand %p954_p1, %p953_p7  ;;  %p960_p3 = por %p959_p13, %p958_p12 }
  0x4e   : > { %p956_p11 = pneg %p955_p6  ;;  %p962_p4 = por %p961_p8, %p960_p3 }
  0x50   : > { %p963_p5 = pnand %p962_p4, %p956_p11 }
  0x52   : > { %966 = shalt.err (!%p963_p5)
}
  0x53   : > { %s967_s27 = scalar_lea.vmem %s1229_s11, 1024  ;;  %s1062_s6 = smov [#allocation7]  }
  0x54   : > { %p968_p10 = scmp.ne.s32.totalorder %s1229_s11, %s967_s27  ;;  %s972_s9 = sshll.u32 %s1062_s6, 4  ;;  %s973_s9 = int_to_ptr.vmem [resolvable:$false] %s972_s9 }
  0x55   : > { %s974_s29 = scalar_lea.vmem %s973_s9, 2048  ;;  %p975_p7 = scmp.lt.s32.totalorder %s1229_s11, %s973_s9 }
  0x56   : > { %p970_p2 = pnand %p968_p10, %p954_p1  ;;  %p976_p6 = scmp.lt.s32.totalorder %s974_s29, %s967_s27 }
  0x58   : > { %p971_p0 = pneg %p970_p2  ;;  %p977_p12 = por %p976_p6, %p975_p7 }
  0x5a   : > { %p978_p13 = pnand %p977_p12, %p971_p0 }
  0x5c   : > { %981 = shalt.err (!%p978_p13)
}
  0x5d   : > { %844 = dma.hbm_to_vmem [thread:$0]  (!%p1361_p9), %s1227_s10, 1024, %s1229_s11, %s1231_s28, %s1060_s17, %s1060_s17, %s1061_s19  }
  0x5e   : > { %p1362_p1 = scmp.ne.s32.totalorder %s1357_s26, 0 }
  0x5f   : > { %p1363_p11 = scmp.eq.s32.totalorder (!%p1362_p1), %s1110_s16, 0 }
  0x60   : > { %178 = sbr.rel (%p1362_p1) target bundleno = 567 (0x237), region = 32 }
  0x67   : > { %1027 = dma.done.wait (%p1363_p11), [#allocation3], 128   ;;  %p1364_p3 = pmov %p1363_p11 }
  0x69   : > { %1029 = vsyncadd (%p1364_p3), [#allocation3], 4294967168  ;;  %p1365_p8 = pmov %p1364_p3 }
  0x6a   : > { %p1366_p4 = pmov %p1364_p3 }
  0x6b   : > { %1031 = dma.done.wait (%p1365_p8), [#allocation6], 256  }
  0x6c   : > { %1033 = vsyncadd (%p1366_p4), [#allocation6], 4294967040  ;;  %s188_s30 = sand.u32 1, %s1110_s16   ;;  %s1274_s17 = sand.u32 1, %s1048_s13  }
  0x6d   : > { %s732_s26 = sshll.u32 %s1274_s17, 6  ;;  %s189_s19 = scalar_lea.sflag [#allocation3], %s188_s30 }
  0x6e   : > { %s192_s10 = scalar_lea.vmem [#allocation7], %s732_s26  ;;  %p1367_p9 = scmp.ne.s32.totalorder %s1354_s23, 0 }
  0x70   : > { %1035 = dma.done.wait (%p1367_p9), %s189_s19, 1024  }
  0x71   : > { %1037 = vsyncadd (%p1367_p9), %s189_s19, 4294966272  ;;  %v1063_v0 = vmov 0.0|0.0   ;;  %vm1064_vm0 = vmmov 0   ;;  %v1065_v1 = vmov 0.0   ;;  %v217_v2 = vld [vmem:[%s192_s10] sm:$0xff]  ;;  %v218_v3 = vld [vmem:[%s192_s10 + $0x8] sm:$0xff] }
  0x72   : > { %806 = vmatprep.subr.bf16.mxu1 %v1063_v0  ;;  %772 = vmatprep.mubr.msk.f32.mxu1 %vm1064_vm0, %v1065_v1  ;;  %v807_v4 = vpack.c.bf16 %v218_v3, %v217_v2  ;;  %v219_v5 = vld [vmem:[%s192_s10 + $0x10] sm:$0xff]  ;;  %v220_v6 = vld [vmem:[%s192_s10 + $0x18] sm:$0xff]  ;;  %v221_v7 = vld [vmem:[%s192_s10 + $0x20] sm:$0xff]  ;;  %vm226_vm1 = vcmask 130048   ;;  %s733_s23 = sshll.u32 %s1274_s17, 5  ;;  %vm609_vm2 = vcmask 97280  }
  0x73   : > { %812 = vmatprep.subr.bf16.mxu0 %v1063_v0  ;;  %786 = vmatprep.mubr.msk.f32.mxu0 %vm1064_vm0, %v1065_v1  ;;  %v222_v8 = vld [vmem:[%s192_s10 + $0x28] sm:$0xff]  ;;  %v810_v10 = vpack.c.bf16 %v220_v6, %v219_v5  ;;  %v223_v12 = vld [vmem:[%s192_s10 + $0x30] sm:$0xff]  ;;  %v224_v13 = vld [vmem:[%s192_s10 + $0x38] sm:$0xff]  ;;  %s214_s11 = scalar_lea.vmem [#allocation8], %s733_s23  ;;  %s749_s20 = sshll.u32 %s1110_s16, 9 }
  0x74   : > { %808 = vmatpush3.bf16.msra.mxu1 %v807_v4  ;;  %v225_v9 = vld [vmem:[#allocation2] sm:$0xff]  ;;  %v813_v11 = vpack.c.bf16 %v222_v8, %v221_v7  ;;  %v816_v14 = vpack.c.bf16 %v224_v13, %v223_v12  ;;  %v510_v15 = vld [vmem:[#allocation5] sm:$0xff]  ;;  %v511_v16 = vld [vmem:[#allocation5 + $0x8] sm:$0xff]  ;;  %s628_s28 = sshll.u32 %s214_s11, 4  ;;  %s1300_s4 = scalar_lea.hbm %s1347_s3, %s749_s20  ;;  %s1295_s28 = int_to_ptr.vmem [resolvable:$true] %s628_s28 }
  0x75   : > { %809 = vmatprep.subr.bf16.mxu1 %v1063_v0  ;;  %v818_v17 = vpack.c.bf16 %v511_v16, %v510_v15  ;;  %s615_s7 = scalar_lea.sflag [#allocation4], %s1274_s17  ;;  %s982_s8 = scalar_lea.vmem %s1295_s28, 512 }
  0x76   : > { %814 = vmatpush3.bf16.msra.mxu0 %v813_v11  ;;  %p983_p5 = scmp.ne.s32.totalorder %s1295_s28, %s982_s8  ;;  %p1368_p10 = scmp.ne.s32.totalorder %s1355_s24, 0 }
  0x77   : > { %773 = vmatmul.mubr.msk.f32.vlgmr.msra.gmra.mrb[0].mxu1 %vm226_vm1, %v225_v9  ;;  %819 = vmatprep.subr.bf16.mxu0 %v818_v17  ;;  %s1066_s16 = smov [#allocation8]  }
  0x78   : > { %811 = vmatpush3.bf16.msra.mxu1 %v810_v10  ;;  %779 = vmatprep.mubr.msk.f32.mxu1 %vm1064_vm0, %v1065_v1  ;;  %p984_p2 = pnand %p983_p5, %p1368_p10  ;;  %s986_s27 = sshll.u32 %s1066_s16, 4  ;;  %s987_s27 = int_to_ptr.vmem [resolvable:$false] %s986_s27 }
  0x79   : > { %815 = vmatprep.subr.bf16.mxu1 %v1063_v0  ;;  %787 = vmatmul.mubr.msk.f32.vlgmr.msra.gmra.mrb[0].mxu0 %vm226_vm1, %v225_v9  ;;  %s988_s6 = scalar_lea.vmem %s987_s27, 1024  ;;  %p989_p7 = scmp.lt.s32.totalorder %s1295_s28, %s987_s27 }
  0x7a   : > { %821 = vmatpush3.bf16.msra.mxu0 %v818_v17  ;;  %p985_p0 = pneg %p984_p2  ;;  %p990_p6 = scmp.lt.s32.totalorder %s988_s6, %s982_s8 }
  0x7b   : > { %780 = vmatmul.mubr.msk.f32.vlgmr.msra.gmra.mrb[2].mxu1 %vm226_vm1, %v225_v9 }
  0x7c   : > { %817 = vmatpush3.bf16.msra.mxu1 %v816_v14  ;;  %793 = vmatprep.mubr.msk.f32.mxu1 %vm1064_vm0, %v1065_v1  ;;  %p991_p12 = por %p990_p6, %p989_p7 }
  0x7e   : > { %p992_p13 = pnand %p991_p12, %p985_p0 }
  0x7f   : > { %794 = vmatmul.mubr.msk.f32.vlgmr.msra.gmra.mrb[4].mxu1 %vm226_vm1, %v225_v9 }
 0x14a   : > { %v296_v18 = vpop.f32.mrb[0].mxu1 }
 0x14b   : > { %v774_v19 = vpop.f32.mrb[1].mxu1  ;;  %800 = vmatprep.mubr.msk.f32.mxu0 %vm226_vm1, %v296_v18 }
 0x14c   : > { %v436_v20 = vpop.f32.mrb[0].mxu0 }
 0x14d   : > { %v788_v21 = vpop.f32.mrb[1].mxu0 }
 0x14e   : > { %v366_v22 = vpop.f32.mrb[2].mxu1 }
 0x14f   : > { %v781_v23 = vpop.f32.mrb[3].mxu1  ;;  %801 = vmatmul.mubr.msk.f32.vlgmr.msra.gmra.mrb[2].mxu0 %vm226_vm1, %v366_v22 }
 0x150   : > { %803 = vmatprep.mubr.msk.f32.mxu0 %vm226_vm1, %v436_v20 }
 0x152   : > { %v506_v24 = vpop.f32.mrb[4].mxu1 }
 0x153   : > { %v795_v25 = vpop.f32.mrb[5].mxu1  ;;  %804 = vmatmul.mubr.msk.f32.gmra.mrb[4].mxu0 %vm226_vm1, %v506_v24 }
 0x222   : > { %v802_v26 = vpop.f32.mrb[2].mxu0 }
 0x223   : > { %611 = vst.msk [vmem:[%s214_s11 + $0x8] sm:$0xff] %vm609_vm2, %v802_v26  ;;  %v590_v27 = vpop.f32.mrb[3].mxu0 }
 0x224   : > { %610 = vst.msk [vmem:[%s214_s11] sm:$0xff] %vm609_vm2, %v590_v27 }
 0x226   : > { %v805_v28 = vpop.f32.mrb[4].mxu0 }
 0x227   : > { %613 = vst.msk [vmem:[%s214_s11 + $0x18] sm:$0xff] %vm609_vm2, %v805_v28  ;;  %v600_v29 = vpop.f32.mrb[5].mxu0 }
 0x228   : > { %612 = vst.msk [vmem:[%s214_s11 + $0x10] sm:$0xff] %vm609_vm2, %v600_v29 }
 0x229   : > { %995 = shalt.err (!%p992_p13)
}
 0x22a   : > { %s996_s9 = scalar_lea.hbm %s1300_s4, 512  ;;  %s1000_s26 = scalar_lea.hbm %s1347_s3, 1024 }
 0x22b   : > { %p997_p1 = scmp.ne.s32.totalorder %s1300_s4, %s996_s9  ;;  %p1001_p8 = scmp.lt.u32.totalorder %s1300_s4, %s1347_s3 }
 0x22c   : > { %p1002_p4 = scmp.lt.u32.totalorder %s1000_s26, %s996_s9  ;;  %p1004_p5 = scmp.lt.u32.totalorder %s996_s9, %s1300_s4 }
 0x22d   : > { %p998_p11 = pnand %p997_p1, %p1368_p10 }
 0x22e   : > { %p1003_p9 = por %p1002_p4, %p1001_p8 }
 0x22f   : > { %p999_p3 = pneg %p998_p11 }
 0x230   : > { %p1005_p2 = por %p1004_p5, %p1003_p9 }
 0x232   : > { %p1006_p0 = pnand %p1005_p2, %p999_p3 }
 0x234   : > { %1009 = shalt.err (!%p1006_p0)
}
 0x235   : > { %s1067_s23 = smov 128   ;;  %s1068_s11 = smov 8  }
 0x236   : > { %832 = dma.vmem_to_hbm [thread:$0]  (%p1368_p10), %s1295_s28, 512, %s1300_s4, %s615_s7, %s1067_s23, %s1067_s23, %s1068_s11  }
 0x237 PF: > { %s643_s20 = sand.u32 1, %s1044_s12   ;;  %p1369_p7 = scmp.ne.s32.totalorder %s1356_s25, 0 }
 0x238   : > { %p1370_p6 = scmp.ge.s32.totalorder %s1056_s15, 2  ;;  %s644_s5 = scalar_lea.sflag [#allocation4], %s643_s20 }
 0x23a   : > { %p846_p12 = pnand %p1370_p6, %p1369_p7 }
 0x23c   : > { %1039 = dma.done.wait (!%p846_p12), %s644_s5, 512  }
 0x23d   : > { %1041 = vsyncadd (!%p846_p12), %s644_s5, 4294966784  ;;  %p15_p13 = scmp.ge.s32.totalorder %s1114_s18, 4   ;;  %s1371_s12 = smov %s1048_s13 }
 0x23e   : > { %s1372_s13 = smov %s1052_s14  ;;  %s1373_s14 = smov %s1126_s21 }
 0x23f   : > { %s1374_s15 = smov %s1114_s18  ;;  %17 = sbr.rel (!%p15_p13) target bundleno = 5 (0x5), region = 84 }
 0x246   :  { %649 = vsyncpa [#allocation3], 1 }
 0x247   :  { %651 = vsyncpa [#allocation3 + $0x1], 1 }
 0x248   :  { %652 = vsyncpa [#allocation6], 1 }
 0x249   :  { %653 = vsyncpa [#allocation4], 1 }
 0x24a   :  { %655 = vsyncpa [#allocation4 + $0x1], 1 }

</bundles_post_ra>
